<compile_context>
chip_gen: v6e
topology: v6e:2x2x1
jax: 0.10.0
libtpu: 0.0.40
codegen_flags: <defaults>
</compile_context>

<pallas_src>
import jax
import jax.numpy as jnp
from jax.experimental import pallas as pl
from jax.experimental.pallas import tpu as pltpu


_LANE = 128
_SUBLANE = 8


def _round_up(x, m):
    return (x + m - 1) // m * m


def _sublane(dtype):
    # Native sublane granularity: 8 rows for 4-byte dtypes, 16 for bf16, ...
    itemsize = jnp.dtype(dtype).itemsize
    return _SUBLANE * max(1, 4 // itemsize)


# ---------------------------------------------------------------------------
# Kernel
# ---------------------------------------------------------------------------
def _recommender_kernel(
    feat_ref, ug_ref, ig_ref,                       # streamed activations (TB, *)
    w1f_ref, w1ug_ref, w1ig_ref, b1_ref,            # fused layer-1 params (resident)
    w2_ref, b2_ref,                                 # layer-2 params, lane-padded (resident)
    out_ref,                                        # (TB, P) lane-dense output
):
    f32 = jnp.float32
    # Fused combiner layer 1:
    #   relu(cat([uf,itf],1)@[wu@w1u ; wi@w1i] + ug@w1ug + ig@w1ig + b1')
    # == relu(cat([uf@wu+bu, itf@wi+bi, ug, ig], 1) @ W1 + b1)
    h = (jnp.dot(feat_ref[...], w1f_ref[...], preferred_element_type=f32)
         + jnp.dot(ug_ref[...], w1ug_ref[...], preferred_element_type=f32)
         + jnp.dot(ig_ref[...], w1ig_ref[...], preferred_element_type=f32)
         + b1_ref[...].astype(f32))
    h = jnp.maximum(h, 0.0)  # ReLU

    # Combiner layer 2 (output columns zero-padded to a multiple of 128).
    score = (jnp.dot(h.astype(w2_ref.dtype), w2_ref[...],
                     preferred_element_type=f32)
             + b2_ref[...].astype(f32))
    out_ref[...] = score.astype(out_ref.dtype)


# ---------------------------------------------------------------------------
# Wrapper
# ---------------------------------------------------------------------------
def autograph_recommender_forward(user_features, item_features,
                                  user_graph_emb, item_graph_emb,
                                  fused, output_dim, *,
                                  block_batch=1024, act_buffers=2,
                                  out_dtype=None):
    """Run the fused recommender forward.  `fused` comes from fuse_params().

    Streams batch tiles through a double-buffered pipeline while the ~100 KB
    of fused weights stay resident in VMEM.  Returns (B, output_dim).
    """
    w_dtype = fused["w1f"].dtype
    out_dtype = w_dtype if out_dtype is None else jnp.dtype(out_dtype)

    B = user_features.shape[0]
    P = fused["w2"].shape[1]              # lane-padded output width (mult of 128)
    h2 = fused["w2"].shape[0]             # combiner hidden width
    gdim = user_graph_emb.shape[1]
    fdim = user_features.shape[1] + item_features.shape[1]

    # --- batch tile selection -------------------------------------------------
    sub = max(_sublane(w_dtype), _sublane(out_dtype))
    b8 = _round_up(B, sub)
    tb = max(sub, min(_round_up(block_batch, sub), b8))
    if b8 >= 2 * sub:
        # >= 2 grid steps so v7x megacore sharding engages (no-op on v5e/v6e).
        tb = min(tb, _round_up(pl.cdiv(b8, 2), sub))
    n_steps = pl.cdiv(b8, tb)
    tb = _round_up(pl.cdiv(b8, n_steps), sub)   # rebalance: near-equal steps
    b_pad = n_steps * tb

    # --- input prep (cast + row pad + feature concat) --------------------------
    def prep(x):
        x = x.astype(w_dtype)
        if x.shape[0] != b_pad:
            x = jnp.pad(x, ((0, b_pad - x.shape[0]), (0, 0)))
        return x

    feat = prep(jnp.concatenate([user_features, item_features], axis=1))
    ug = prep(user_graph_emb)
    ig = prep(item_graph_emb)

    # --- specs ------------------------------------------------------------------
    pipeline_mode = pl.Buffered(act_buffers) if act_buffers != 2 else None

    def act_spec(d):
        # Stream (tb, d) row-blocks; features live on the lane axis.
        if pipeline_mode is None:
            return pl.BlockSpec((tb, d), lambda i: (i, 0))
        return pl.BlockSpec((tb, d), lambda i: (i, 0),
                            pipeline_mode=pipeline_mode)

    def resident_spec(x):
        # Whole array, same block every grid step -> stays resident in VMEM.
        return pl.BlockSpec(x.shape, lambda i: (0, 0))

    weights = (fused["w1f"], fused["w1ug"], fused["w1ig"],
               fused["b1"], fused["w2"], fused["b2"])
    weight_bytes = sum(int(w.size) * jnp.dtype(w.dtype).itemsize for w in weights)

    act_itemsize = jnp.dtype(w_dtype).itemsize
    out_itemsize = jnp.dtype(out_dtype).itemsize
    k_total = fdim + 2 * gdim

    cost = pl.CostEstimate(
        flops=2 * b_pad * (k_total * h2 + h2 * P),
        transcendentals=0,
        bytes_accessed=(b_pad * k_total * act_itemsize
                        + b_pad * P * out_itemsize + weight_bytes))

    step_bytes = tb * k_total * act_itemsize + tb * P * out_itemsize
    vmem_limit = int(min(max(max(act_buffers, 2) * 2 * step_bytes + weight_bytes,
                             32 << 20),
                         64 << 20))   # cap: v7x physical VMEM per TC

    out = pl.pallas_call(
        _recommender_kernel,
        out_shape=jax.ShapeDtypeStruct((b_pad, P), out_dtype),
        grid_spec=pltpu.PrefetchScalarGridSpec(
            num_scalar_prefetch=0,
            grid=(n_steps,),
            in_specs=[act_spec(fdim), act_spec(gdim), act_spec(gdim)]
                     + [resident_spec(w) for w in weights],
            out_specs=pl.BlockSpec((tb, P), lambda i: (i, 0)),
        ),
        compiler_params=pltpu.CompilerParams(
            dimension_semantics=("parallel",),    # megacore-shard batch on v7x
            vmem_limit_bytes=vmem_limit),
        cost_estimate=cost,
    )(feat, ug, ig, *weights)

    # NOTE: zero-padded batch rows carry ReLU(b1')-derived garbage and the
    # columns >= output_dim are zero-weight padding -- never consume the
    # padded slab directly.
    return out[:B, :output_dim]


# ---------------------------------------------------------------------------
# Parameter construction (PyTorch-Linear-style init, transposed to (in, out))
# ---------------------------------------------------------------------------
def init_params(key, user_dim, item_dim, hidden_dim, output_dim, num_heads):
    """Raw (un-fused) params.  W1 is stored split into the four column blocks
    matching the concat order [user_emb, item_emb, user_graph_emb, item_graph_emb]."""
    total_dim = hidden_dim * 2 + hidden_dim * num_heads * 2
    hd2 = hidden_dim * 2
    gdim = hidden_dim * num_heads

    def linear(k, fan_in, fan_out):
        kw, kb = jax.random.split(k)
        bound = 1.0 / jnp.sqrt(fan_in)
        w = jax.random.uniform(kw, (fan_in, fan_out), jnp.float32, -bound, bound)
        b = jax.random.uniform(kb, (1, fan_out), jnp.float32, -bound, bound)
        return w, b

    k1, k2, k3, k4 = jax.random.split(key, 4)
    wu, bu = linear(k1, user_dim, hidden_dim)
    wi, bi = linear(k2, item_dim, hidden_dim)
    w1, b1 = linear(k3, total_dim, hd2)
    w2, b2 = linear(k4, hd2, output_dim)

    w1u = w1[:hidden_dim]
    w1i = w1[hidden_dim:2 * hidden_dim]
    w1ug = w1[2 * hidden_dim:2 * hidden_dim + gdim]
    w1ig = w1[2 * hidden_dim + gdim:]

    return dict(wu=wu, bu=bu, wi=wi, bi=bi,
                w1u=w1u, w1i=w1i, w1ug=w1ug, w1ig=w1ig, b1=b1,
                w2=w2, b2=b2)


def fuse_params(raw, *, lane_pad=_LANE, dtype=jnp.bfloat16):
    """Fold the activation-free encoder Linears into combiner layer 1, stack
    them into one feature weight, and lane-pad layer 2.  Fold is done in f32;
    only the matrices are cast to `dtype` (biases stay f32)."""
    w1f = jnp.concatenate([raw["wu"] @ raw["w1u"],
                           raw["wi"] @ raw["w1i"]], axis=0)     # (u+i dim, 2*hidden)
    b1f = raw["b1"] + raw["bu"] @ raw["w1u"] + raw["bi"] @ raw["w1i"]

    out_dim = raw["w2"].shape[1]
    p = _round_up(max(out_dim, lane_pad), lane_pad)
    w2p = jnp.pad(raw["w2"], ((0, 0), (0, p - out_dim)))
    b2p = jnp.pad(raw["b2"], ((0, 0), (0, p - out_dim)))

    fused = dict(w1f=w1f.astype(dtype),
                 w1ug=raw["w1ug"].astype(dtype),
                 w1ig=raw["w1ig"].astype(dtype),
                 b1=b1f.astype(jnp.float32),
                 w2=w2p.astype(dtype),
                 b2=b2p.astype(jnp.float32))
    return fused, out_dim


# ---------------------------------------------------------------------------
# Pure-JAX reference (PyTorch semantics: encoders -> cat -> MLP)
# ---------------------------------------------------------------------------
def reference_forward(uf, itf, ug, ig, p):
    u = uf @ p["wu"] + p["bu"]
    i = itf @ p["wi"] + p["bi"]
    w1 = jnp.concatenate([p["w1u"], p["w1i"], p["w1ug"], p["w1ig"]], axis=0)
    combined = jnp.concatenate([u, i, ug, ig], axis=1)
    h = jnp.maximum(combined @ w1 + p["b1"], 0.0)
    return h @ p["w2"] + p["b2"]


if __name__ == "__main__":
    # Small, module-consistent shapes.
    batch = 8
    user_dim = 16
    item_dim = 16
    hidden_dim = 32
    output_dim = 8
    num_heads = 4
    graph_dim = hidden_dim * num_heads  # 128

    key = jax.random.PRNGKey(0)
    kp, ku, ki, kug, kig = jax.random.split(key, 5)

    raw = init_params(kp, user_dim, item_dim, hidden_dim, output_dim, num_heads)

    user_features = jax.random.normal(ku, (batch, user_dim), jnp.float32)
    item_features = jax.random.normal(ki, (batch, item_dim), jnp.float32)
    user_graph_emb = jax.random.normal(kug, (batch, graph_dim), jnp.float32)
    item_graph_emb = jax.random.normal(kig, (batch, graph_dim), jnp.float32)

    ref = reference_forward(user_features, item_features,
                            user_graph_emb, item_graph_emb, raw)

    # --- f32 path: bit-accurate check against the PyTorch-semantics reference.
    fused32, od = fuse_params(raw, dtype=jnp.float32)
    out32 = autograph_recommender_forward(
        user_features, item_features, user_graph_emb, item_graph_emb,
        fused32, od)
    out32 = jax.block_until_ready(out32)
    assert out32.shape == (batch, output_dim)
    assert jnp.allclose(out32.astype(jnp.float32), ref, atol=1e-4, rtol=1e-4)

    # --- bf16 streaming path (deployment config; ~2x HBM byte reduction).
    fused16, od = fuse_params(raw, dtype=jnp.bfloat16)
    out16 = autograph_recommender_forward(
        user_features, item_features, user_graph_emb, item_graph_emb,
        fused16, od)
    out16 = jax.block_until_ready(out16)
    assert out16.shape == (batch, output_dim)
    assert jnp.allclose(out16.astype(jnp.float32), ref, atol=1e-1, rtol=1e-1)

    print("KERNEL_OK")
</pallas_src>

<mosaic_0001>
module attributes {stable_mosaic.version = 11 : i64} {
  func.func @_recommender_kernel(%arg0: i32, %arg1: memref<8x32xf32, #tpu.memory_space<vmem>>, %arg2: memref<8x128xf32, #tpu.memory_space<vmem>>, %arg3: memref<8x128xf32, #tpu.memory_space<vmem>>, %arg4: memref<32x64xf32, #tpu.memory_space<vmem>>, %arg5: memref<128x64xf32, #tpu.memory_space<vmem>>, %arg6: memref<128x64xf32, #tpu.memory_space<vmem>>, %arg7: memref<1x64xf32, #tpu.memory_space<vmem>>, %arg8: memref<64x128xf32, #tpu.memory_space<vmem>>, %arg9: memref<1x128xf32, #tpu.memory_space<vmem>>, %arg10: memref<8x128xf32, #tpu.memory_space<vmem>>) attributes {dimension_semantics = [#tpu.dimension_semantics<parallel>], iteration_bounds = array<i64: 1>, scalar_prefetch = 0 : i64, scratch_operands = 0 : i64, tpu.core_type = #tpu.core_type<tc>, window_params = [{transform_indices = @transform_0, window_bounds = array<i64: 8, 32>}, {transform_indices = @transform_1, window_bounds = array<i64: 8, 128>}, {transform_indices = @transform_2, window_bounds = array<i64: 8, 128>}, {pipeline_mode = #tpu.pipeline_mode<synchronous>, transform_indices = @transform_3, window_bounds = array<i64: 32, 64>}, {pipeline_mode = #tpu.pipeline_mode<synchronous>, transform_indices = @transform_4, window_bounds = array<i64: 128, 64>}, {pipeline_mode = #tpu.pipeline_mode<synchronous>, transform_indices = @transform_5, window_bounds = array<i64: 128, 64>}, {pipeline_mode = #tpu.pipeline_mode<synchronous>, transform_indices = @transform_6, window_bounds = array<i64: 1, 64>}, {pipeline_mode = #tpu.pipeline_mode<synchronous>, transform_indices = @transform_7, window_bounds = array<i64: 64, 128>}, {pipeline_mode = #tpu.pipeline_mode<synchronous>, transform_indices = @transform_8, window_bounds = array<i64: 1, 128>}, {transform_indices = @transform_9, window_bounds = array<i64: 8, 128>}]} {
    %c0 = arith.constant 0 : index
    %c0_0 = arith.constant 0 : index
    %0 = vector.load %arg1[%c0, %c0_0] : memref<8x32xf32, #tpu.memory_space<vmem>>, vector<8x32xf32>
    %c0_1 = arith.constant 0 : index
    %c0_2 = arith.constant 0 : index
    %1 = vector.load %arg4[%c0_1, %c0_2] : memref<32x64xf32, #tpu.memory_space<vmem>>, vector<32x64xf32>
    %cst = arith.constant dense<0.000000e+00> : vector<8x64xf32>
    %2 = tpu.matmul %0, %1, %cst {dimension_numbers = #tpu.dot_dimension_numbers<[1], [0], [0], [1], [0, 0, 1, 1], [], []>} : vector<8x32xf32>, vector<32x64xf32>, vector<8x64xf32> -> vector<8x64xf32>
    %c0_3 = arith.constant 0 : index
    %c0_4 = arith.constant 0 : index
    %3 = vector.load %arg2[%c0_3, %c0_4] : memref<8x128xf32, #tpu.memory_space<vmem>>, vector<8x128xf32>
    %c0_5 = arith.constant 0 : index
    %c0_6 = arith.constant 0 : index
    %4 = vector.load %arg5[%c0_5, %c0_6] : memref<128x64xf32, #tpu.memory_space<vmem>>, vector<128x64xf32>
    %cst_7 = arith.constant dense<0.000000e+00> : vector<8x64xf32>
    %5 = tpu.matmul %3, %4, %cst_7 {dimension_numbers = #tpu.dot_dimension_numbers<[1], [0], [0], [1], [0, 0, 1, 1], [], []>} : vector<8x128xf32>, vector<128x64xf32>, vector<8x64xf32> -> vector<8x64xf32>
    %6 = arith.addf %2, %5 : vector<8x64xf32>
    %c0_8 = arith.constant 0 : index
    %c0_9 = arith.constant 0 : index
    %7 = vector.load %arg3[%c0_8, %c0_9] : memref<8x128xf32, #tpu.memory_space<vmem>>, vector<8x128xf32>
    %c0_10 = arith.constant 0 : index
    %c0_11 = arith.constant 0 : index
    %8 = vector.load %arg6[%c0_10, %c0_11] : memref<128x64xf32, #tpu.memory_space<vmem>>, vector<128x64xf32>
    %cst_12 = arith.constant dense<0.000000e+00> : vector<8x64xf32>
    %9 = tpu.matmul %7, %8, %cst_12 {dimension_numbers = #tpu.dot_dimension_numbers<[1], [0], [0], [1], [0, 0, 1, 1], [], []>} : vector<8x128xf32>, vector<128x64xf32>, vector<8x64xf32> -> vector<8x64xf32>
    %10 = arith.addf %6, %9 : vector<8x64xf32>
    %c0_13 = arith.constant 0 : index
    %c0_14 = arith.constant 0 : index
    %11 = vector.load %arg7[%c0_13, %c0_14] : memref<1x64xf32, #tpu.memory_space<vmem>>, vector<1x64xf32>
    %12 = vector.broadcast %11 : vector<1x64xf32> to vector<8x64xf32>
    %13 = arith.addf %10, %12 : vector<8x64xf32>
    %cst_15 = arith.constant 0.000000e+00 : f32
    %14 = vector.broadcast %cst_15 : f32 to vector<8x64xf32>
    %15 = arith.maximumf %13, %14 : vector<8x64xf32>
    %c0_16 = arith.constant 0 : index
    %c0_17 = arith.constant 0 : index
    %16 = vector.load %arg8[%c0_16, %c0_17] : memref<64x128xf32, #tpu.memory_space<vmem>>, vector<64x128xf32>
    %cst_18 = arith.constant dense<0.000000e+00> : vector<8x128xf32>
    %17 = tpu.matmul %15, %16, %cst_18 {dimension_numbers = #tpu.dot_dimension_numbers<[1], [0], [0], [1], [0, 0, 1, 1], [], []>} : vector<8x64xf32>, vector<64x128xf32>, vector<8x128xf32> -> vector<8x128xf32>
    %c0_19 = arith.constant 0 : index
    %c0_20 = arith.constant 0 : index
    %18 = vector.load %arg9[%c0_19, %c0_20] : memref<1x128xf32, #tpu.memory_space<vmem>>, vector<1x128xf32>
    %19 = vector.broadcast %18 : vector<1x128xf32> to vector<8x128xf32>
    %20 = arith.addf %17, %19 : vector<8x128xf32>
    %c0_21 = arith.constant 0 : index
    %c0_22 = arith.constant 0 : index
    %21 = vector.load %arg10[%c0_21, %c0_22] : memref<8x128xf32, #tpu.memory_space<vmem>>, vector<8x128xf32>
    tpu.vector_store %arg10[%c0_21, %c0_22], %20 {strides = array<i32>} : memref<8x128xf32, #tpu.memory_space<vmem>>, vector<8x128xf32>,
    return
  }
  func.func @transform_0(%arg0: i32) -> (i32, i32) {
    %c0_i32 = arith.constant 0 : i32
    %c0_i32_0 = arith.constant 0 : i32
    return %arg0, %c0_i32 : i32, i32
  }
  func.func @transform_1(%arg0: i32) -> (i32, i32) {
    %c0_i32 = arith.constant 0 : i32
    %c0_i32_0 = arith.constant 0 : i32
    return %arg0, %c0_i32 : i32, i32
  }
  func.func @transform_2(%arg0: i32) -> (i32, i32) {
    %c0_i32 = arith.constant 0 : i32
    %c0_i32_0 = arith.constant 0 : i32
    return %arg0, %c0_i32 : i32, i32
  }
  func.func @transform_3(%arg0: i32) -> (i32, i32) {
    %c0_i32 = arith.constant 0 : i32
    %c0_i32_0 = arith.constant 0 : i32
    %c0_i32_1 = arith.constant 0 : i32
    return %c0_i32, %c0_i32_0 : i32, i32
  }
  func.func @transform_4(%arg0: i32) -> (i32, i32) {
    %c0_i32 = arith.constant 0 : i32
    %c0_i32_0 = arith.constant 0 : i32
    %c0_i32_1 = arith.constant 0 : i32
    return %c0_i32, %c0_i32_0 : i32, i32
  }
  func.func @transform_5(%arg0: i32) -> (i32, i32) {
    %c0_i32 = arith.constant 0 : i32
    %c0_i32_0 = arith.constant 0 : i32
    %c0_i32_1 = arith.constant 0 : i32
    return %c0_i32, %c0_i32_0 : i32, i32
  }
  func.func @transform_6(%arg0: i32) -> (i32, i32) {
    %c0_i32 = arith.constant 0 : i32
    %c0_i32_0 = arith.constant 0 : i32
    %c0_i32_1 = arith.constant 0 : i32
    return %c0_i32, %c0_i32_0 : i32, i32
  }
  func.func @transform_7(%arg0: i32) -> (i32, i32) {
    %c0_i32 = arith.constant 0 : i32
    %c0_i32_0 = arith.constant 0 : i32
    %c0_i32_1 = arith.constant 0 : i32
    return %c0_i32, %c0_i32_0 : i32, i32
  }
  func.func @transform_8(%arg0: i32) -> (i32, i32) {
    %c0_i32 = arith.constant 0 : i32
    %c0_i32_0 = arith.constant 0 : i32
    %c0_i32_1 = arith.constant 0 : i32
    return %c0_i32, %c0_i32_0 : i32, i32
  }
  func.func @transform_9(%arg0: i32) -> (i32, i32) {
    %c0_i32 = arith.constant 0 : i32
    %c0_i32_0 = arith.constant 0 : i32
    return %arg0, %c0_i32 : i32, i32
  }
}

</mosaic_0001>

<bundles_post_ra>
// kernel: tpu_custom_call.1
= control target key start
LH: loop header
LB: loop body
LE: loop exit
PB: predicated region body
PF: predicated region fallthrough
CT: control target
= control target key end

     0   :  { %v577_v2 = vmov 0.0   ;;  %vm125_vm0 = vcmask 261120   ;;  %vm578_vm1 = vmmov 0   ;;  %s832_s0 = inlined_call_operand.vmem [shape: f32[8,32], index: 0, kind: input, shape index: {}]   ;;  %s833_s1 = inlined_call_operand.vmem [shape: f32[8,128], index: 1, kind: input, shape index: {}]   ;;  %s834_s2 = inlined_call_operand.vmem [shape: f32[8,128], index: 2, kind: input, shape index: {}]   ;;  %s835_s3 = inlined_call_operand.vmem [shape: f32[32,64], index: 3, kind: input, shape index: {}]   ;;  %s836_s4 = inlined_call_operand.vmem [shape: f32[128,64], index: 4, kind: input, shape index: {}]   ;;  %s837_s5 = inlined_call_operand.vmem [shape: f32[128,64], index: 5, kind: input, shape index: {}]   ;;  %s838_s6 = inlined_call_operand.vmem [shape: f32[1,64], index: 6, kind: input, shape index: {}]   ;;  %s839_s7 = inlined_call_operand.vmem [shape: f32[64,128], index: 7, kind: input, shape index: {}]   ;;  %s840_s8 = inlined_call_operand.vmem [shape: f32[1,128], index: 8, kind: input, shape index: {}]   ;;  %s841_s9 = inlined_call_operand.hbm [shape: f32[8,128], index: 9, kind: output, shape index: {}]  }
   0x1   :  { %v54_v0 = vld [vmem:[%s836_s4 + $0x78] sm:$0xff]  ;;  %452 = vmatprep.subr.mxu0 %v577_v2  ;;  %487 = vmatprep.subr.mxu1 %v577_v2  ;;  %v53_v3 = vld [vmem:[%s836_s4 + $0x70] sm:$0xff]  ;;  %v52_v5 = vld [vmem:[%s836_s4 + $0x68] sm:$0xff] }
   0x2   :  { %v37_v1 = vld [vmem:[%s835_s3 + $0x18] sm:$0xff]  ;;  %v36_v4 = vld [vmem:[%s835_s3 + $0x10] sm:$0xff]  ;;  %453 = vmatpush3.msra.mxu0 %v54_v0  ;;  %v35_v6 = vld [vmem:[%s835_s3 + $0x8] sm:$0xff]  ;;  %495 = vmatprep.mubr.msk.f32.mxu1 %vm578_vm1, %v577_v2 }
   0x3   :  { %488 = vmatpush3.msra.mxu1 %v37_v1  ;;  %454 = vmatprep.subr.mxu0 %v577_v2  ;;  %v51_v7 = vld [vmem:[%s836_s4 + $0x60] sm:$0xff]  ;;  %v50_v10 = vld [vmem:[%s836_s4 + $0x58] sm:$0xff]  ;;  %v49_v12 = vld [vmem:[%s836_s4 + $0x50] sm:$0xff] }
   0x4   :  { %489 = vmatprep.subr.mxu1 %v577_v2  ;;  %455 = vmatpush3.msra.mxu0 %v53_v3  ;;  %v34_v8 = vld [vmem:[%s835_s3] sm:$0xff]  ;;  %v215_v11 = vld [vmem:[%s837_s5 + $0x78] sm:$0xff]  ;;  %v214_v13 = vld [vmem:[%s837_s5 + $0x70] sm:$0xff] }
   0x5   :  { %490 = vmatpush3.msra.mxu1 %v36_v4  ;;  %456 = vmatprep.subr.mxu0 %v577_v2  ;;  %v33_v9 = vld [vmem:[%s832_s0] sm:$0xff]  ;;  %v48_v14 = vld [vmem:[%s836_s4 + $0x48] sm:$0xff] }
   0x6   :  { %491 = vmatprep.subr.mxu1 %v577_v2  ;;  %457 = vmatpush3.msra.mxu0 %v52_v5  ;;  %v213_v15 = vld [vmem:[%s837_s5 + $0x68] sm:$0xff] }
   0x7   :  { %492 = vmatpush3.msra.mxu1 %v35_v6  ;;  %458 = vmatprep.subr.mxu0 %v577_v2 }
   0x8   :  { %493 = vmatprep.subr.mxu1 %v577_v2  ;;  %459 = vmatpush3.msra.mxu0 %v51_v7 }
   0x9   :  { %494 = vmatpush3.msra.mxu1 %v34_v8  ;;  %460 = vmatprep.subr.mxu0 %v577_v2 }
   0xa   :  { %496 = vmatmul.mubr.msk.f32.vlgmr.msra.gmra.mxu1 %vm125_vm0, %v33_v9  ;;  %498 = vmatprep.subr.mxu1 %v577_v2 }
   0xb   :  { %461 = vmatpush3.msra.mxu0 %v50_v10  ;;  %499 = vmatpush3.msra.mxu1 %v215_v11 }
   0xc   :  { %462 = vmatprep.subr.mxu0 %v577_v2  ;;  %500 = vmatprep.subr.mxu1 %v577_v2 }
   0xd   :  { %463 = vmatpush3.msra.mxu0 %v49_v12  ;;  %501 = vmatpush3.msra.mxu1 %v214_v13 }
   0xe   :  { %14 = vsyncpa [#allocation3], 0  ;;  %464 = vmatprep.subr.mxu0 %v577_v2  ;;  %502 = vmatprep.subr.mxu1 %v577_v2  ;;  %v47_v16 = vld [vmem:[%s836_s4 + $0x40] sm:$0xff]  ;;  %v46_v18 = vld [vmem:[%s836_s4 + $0x38] sm:$0xff]  ;;  %vm311_vm2 = vcmask 523264  }
   0xf   :  { %v212_v17 = vld [vmem:[%s837_s5 + $0x60] sm:$0xff]  ;;  %465 = vmatpush3.msra.mxu0 %v48_v14  ;;  %503 = vmatpush3.msra.mxu1 %v213_v15  ;;  %v211_v19 = vld [vmem:[%s837_s5 + $0x58] sm:$0xff]  ;;  %v45_v20 = vld [vmem:[%s836_s4 + $0x30] sm:$0xff] }
  0x10   :  { %466 = vmatprep.subr.mxu0 %v577_v2  ;;  %504 = vmatprep.subr.mxu1 %v577_v2  ;;  %v210_v21 = vld [vmem:[%s837_s5 + $0x50] sm:$0xff]  ;;  %v44_v22 = vld [vmem:[%s836_s4 + $0x28] sm:$0xff]  ;;  %v43_v24 = vld [vmem:[%s836_s4 + $0x20] sm:$0xff] }
  0x11   :  { %467 = vmatpush3.msra.mxu0 %v47_v16  ;;  %505 = vmatpush3.msra.mxu1 %v212_v17  ;;  %v209_v23 = vld [vmem:[%s837_s5 + $0x48] sm:$0xff]  ;;  %v208_v25 = vld [vmem:[%s837_s5 + $0x40] sm:$0xff]  ;;  %v42_v26 = vld [vmem:[%s836_s4 + $0x18] sm:$0xff] }
  0x12   :  { %468 = vmatprep.subr.mxu0 %v577_v2  ;;  %506 = vmatprep.subr.mxu1 %v577_v2  ;;  %v207_v27 = vld [vmem:[%s837_s5 + $0x38] sm:$0xff]  ;;  %v41_v28 = vld [vmem:[%s836_s4 + $0x10] sm:$0xff]  ;;  %v40_v30 = vld [vmem:[%s836_s4 + $0x8] sm:$0xff] }
  0x13   :  { %469 = vmatpush3.msra.mxu0 %v46_v18  ;;  %507 = vmatpush3.msra.mxu1 %v211_v19  ;;  %v206_v29 = vld [vmem:[%s837_s5 + $0x30] sm:$0xff]  ;;  %v205_v31 = vld [vmem:[%s837_s5 + $0x28] sm:$0xff]  ;;  %v39_v32 = vld [vmem:[%s836_s4] sm:$0xff] }
  0x14   :  { %470 = vmatprep.subr.mxu0 %v577_v2  ;;  %508 = vmatprep.subr.mxu1 %v577_v2  ;;  %v204_v33 = vld [vmem:[%s837_s5 + $0x20] sm:$0xff]  ;;  %v203_v35 = vld [vmem:[%s837_s5 + $0x18] sm:$0xff]  ;;  %v202_v36 = vld [vmem:[%s837_s5 + $0x10] sm:$0xff] }
  0x15   :  { %471 = vmatpush3.msra.mxu0 %v45_v20  ;;  %509 = vmatpush3.msra.mxu1 %v210_v21  ;;  %v38_v34 = vld [vmem:[%s833_s1] sm:$0xff]  ;;  %v201_v37 = vld [vmem:[%s837_s5 + $0x8] sm:$0xff]  ;;  %v303_v40 = vld [vmem:[%s839_s7 + $0x38] sm:$0xff] }
  0x16   :  { %472 = vmatprep.subr.mxu0 %v577_v2  ;;  %510 = vmatprep.subr.mxu1 %v577_v2  ;;  %v200_v38 = vld [vmem:[%s837_s5] sm:$0xff]  ;;  %v302_v41 = vld [vmem:[%s839_s7 + $0x30] sm:$0xff]  ;;  %v301_v42 = vld [vmem:[%s839_s7 + $0x28] sm:$0xff] }
  0x17   :  { %473 = vmatpush3.msra.mxu0 %v44_v22  ;;  %511 = vmatpush3.msra.mxu1 %v209_v23  ;;  %v199_v39 = vld [vmem:[%s834_s2] sm:$0xff]  ;;  %v299_v44 = vld [vmem:[%s839_s7 + $0x18] sm:$0xff]  ;;  %v298_v45 = vld [vmem:[%s839_s7 + $0x10] sm:$0xff] }
  0x18   :  { %474 = vmatprep.subr.mxu0 %v577_v2  ;;  %512 = vmatprep.subr.mxu1 %v577_v2  ;;  %v300_v43 = vld [vmem:[%s839_s7 + $0x20] sm:$0xff]  ;;  %v297_v46 = vld [vmem:[%s839_s7 + $0x8] sm:$0xff] }
  0x19   :  { %475 = vmatpush3.msra.mxu0 %v43_v24  ;;  %513 = vmatpush3.msra.mxu1 %v208_v25  ;;  %v296_v47 = vld [vmem:[%s839_s7] sm:$0xff]  ;;  %s579_s7 = smov [#allocation2]  }
  0x1a   :  { %476 = vmatprep.subr.mxu0 %v577_v2  ;;  %514 = vmatprep.subr.mxu1 %v577_v2  ;;  %v401_v54 = vld [vmem:[%s838_s6] ss:$0 sm:$0xff]  ;;  %s392_s10 = sshll.u32 %s579_s7, 4  ;;  %s393_s10 = int_to_ptr.vmem [resolvable:$true] %s392_s10 }
  0x1b   :  { %477 = vmatpush3.msra.mxu0 %v42_v26  ;;  %515 = vmatpush3.msra.mxu1 %v207_v27  ;;  %v402_v59 = vld [vmem:[%s840_s8] ss:$0 sm:$0xff]  ;;  %s555_s1 = scalar_lea.vmem %s393_s10, 128  ;;  %p560_p1 = scmp.lt.s32.totalorder %s393_s10, %s393_s10 }
  0x1c   :  { %478 = vmatprep.subr.mxu0 %v577_v2  ;;  %516 = vmatprep.subr.mxu1 %v577_v2  ;;  %p556_p0 = scmp.ne.s32.totalorder %s393_s10, %s555_s1  ;;  %p561_p2 = scmp.lt.s32.totalorder %s555_s1, %s555_s1 }
  0x1d   :  { %479 = vmatpush3.msra.mxu0 %v41_v28  ;;  %517 = vmatpush3.msra.mxu1 %v206_v29 }
  0x1e   :  { %480 = vmatprep.subr.mxu0 %v577_v2  ;;  %518 = vmatprep.subr.mxu1 %v577_v2  ;;  %p562_p3 = por %p561_p2, %p560_p1 }
  0x1f   :  { %481 = vmatpush3.msra.mxu0 %v40_v30  ;;  %519 = vmatpush3.msra.mxu1 %v205_v31 }
  0x20   :  { %482 = vmatprep.subr.mxu0 %v577_v2  ;;  %520 = vmatprep.subr.mxu1 %v577_v2  ;;  %p563_p4 = pnand %p562_p3, %p556_p0 }
  0x21   :  { %483 = vmatpush3.msra.mxu0 %v39_v32  ;;  %484 = vmatprep.mubr.msk.f32.mxu0 %vm578_vm1, %v577_v2 }
  0x22   :  { %521 = vmatpush3.msra.mxu1 %v204_v33  ;;  %485 = vmatmul.mubr.f32.vlgmr.msra.gmra.mxu0 %v38_v34 }
  0x23   :  { %522 = vmatprep.subr.mxu1 %v577_v2  ;;  %530 = vmatprep.mubr.msk.f32.mxu1 %vm578_vm1, %v577_v2 }
  0x24   :  { %523 = vmatpush3.msra.mxu1 %v203_v35  ;;  %533 = vmatprep.subr.mxu0 %v577_v2 }
  0x25   :  { %524 = vmatprep.subr.mxu1 %v577_v2  ;;  %549 = vmatprep.mubr.msk.f32.mxu0 %vm578_vm1, %v577_v2 }
  0x26   :  { %525 = vmatpush3.msra.mxu1 %v202_v36  ;;  %534 = vmatpush3.msra.mxu0 %v303_v40 }
  0x27   :  { %526 = vmatprep.subr.mxu1 %v577_v2  ;;  %535 = vmatprep.subr.mxu0 %v577_v2 }
  0x28   :  { %527 = vmatpush3.msra.mxu1 %v201_v37  ;;  %536 = vmatpush3.msra.mxu0 %v302_v41 }
  0x29   :  { %528 = vmatprep.subr.mxu1 %v577_v2  ;;  %537 = vmatprep.subr.mxu0 %v577_v2 }
  0x2a   :  { %529 = vmatpush3.msra.mxu1 %v200_v38  ;;  %538 = vmatpush3.msra.mxu0 %v301_v42 }
  0x2b   :  { %531 = vmatmul.mubr.f32.vlgmr.msra.gmra.mxu1 %v199_v39  ;;  %539 = vmatprep.subr.mxu0 %v577_v2 }
  0x2c   :  { %540 = vmatpush3.msra.mxu0 %v300_v43 }
  0x2d   :  { %541 = vmatprep.subr.mxu0 %v577_v2 }
  0x2e   :  { %542 = vmatpush3.msra.mxu0 %v299_v44 }
  0x2f   :  { %543 = vmatprep.subr.mxu0 %v577_v2 }
  0x30   :  { %544 = vmatpush3.msra.mxu0 %v298_v45 }
  0x31   :  { %545 = vmatprep.subr.mxu0 %v577_v2 }
  0x32   :  { %546 = vmatpush3.msra.mxu0 %v297_v46 }
  0x33   :  { %547 = vmatprep.subr.mxu0 %v577_v2 }
  0x34   :  { %548 = vmatpush3.msra.mxu0 %v296_v47 }
  0xca   :  { %v195_v48 = vpop.f32.mrf.mxu1 }
  0xcc   :  { %v497_v49 = vpop.f32.mrf.mxu1 }
  0xe2   :  { %v121_v50 = vpop.f32.mrf.mxu0 }
  0xe3   :  { %v196_v52 = vadd.f32 %v195_v48, %v121_v50 }
  0xe4   :  { %v486_v51 = vpop.f32.mrf.mxu0 }
  0xeb   :  { %v282_v53 = vpop.f32.mrf.mxu1 }
  0xec   :  { %v286_v55 = vadd.f32 %v282_v53, %v196_v52 }
  0xed   :  { %v532_v56 = vpop.f32.mrf.mxu1 }
  0xee   :  { %v294_v57 = vadd.f32 %v401_v54, %v286_v55 }
  0xf0   :  { %v295_v58 = vmax.f32 %v294_v57, 0.0 }
  0xf2   :  { %550 = vmatmul.mubr.msk.f32.vlgmr.msra.gmra.mxu0 %vm311_vm2, %v295_v58 }
 0x1b2   :  { %v381_v60 = vpop.f32.mrf.mxu0 }
 0x1b3   :  { %v382_v61 = vadd.f32 %v402_v59, %v381_v60 }
 0x1b4   :  { %v551_v62 = vpop.f32.mrf.mxu0 }
 0x1b5   :  { %385 = vst [vmem:[#allocation2] sm:$0xff] %v382_v61 }
 0x1b6   :  { %566 = shalt.err (!%p563_p4)
}
 0x1b7   :  { %395 = dma.vmem_to_hbm [thread:$0]  %s393_s10, 128, %s841_s9, [#allocation3]  }
 0x1b8   :  { %575 = dma.done.wait [#allocation3], 128  }
 0x1b9   :  { %576 = vsyncadd [#allocation3], 4294967168 }
 0x1ba   :  { %399 = vsyncpa [#allocation3], 1 }

</bundles_post_ra>
